<compile_context>
chip_gen: v7x
topology: tpu7x:2x2x1
jax: 0.10.0
libtpu: 0.0.40
codegen_flags: <defaults>
</compile_context>

<pallas_src>
import functools

import jax
import jax.numpy as jnp
from jax import lax
from jax.experimental import pallas as pl
from jax.experimental.pallas import tpu as pltpu

D_IN, D_HID, D_OUT = 10, 20, 2


def _mlp_kernel(x_ref, w1_ref, b1_ref, w2_ref, b2_ref, o_ref):
    # x arrives in its natural (TB, 10) layout; the transpose is folded into
    # fc1 by contracting on the last axes of both operands:
    #   (20, 10) . (TB, 10)^T -> (20, TB)    (batch on the 128-lane axis)
    x = x_ref[...]                       # (TB, 10)  f32
    w1 = w1_ref[...]                     # (20, 10)  f32  (grid-invariant block)
    b1 = b1_ref[...]                     # (20, 1)   f32
    w2 = w2_ref[...]                     # (2, 20)   f32
    b2 = b2_ref[...]                     # (2, 1)    f32

    h = lax.dot_general(
        w1, x, (((1,), (1,)), ((), ())),
        preferred_element_type=jnp.float32) + b1      # (20, TB)
    h = jnp.maximum(h, 0.0)                           # ReLU on VPU

    y = jnp.dot(w2, h, preferred_element_type=jnp.float32) + b2   # (2, TB)
    o_ref[...] = y.astype(o_ref.dtype)                # lane-dense (2, TB) store


@functools.partial(jax.jit, static_argnames=("tb",))
def net_forward(x, w1, b1, w2, b2, *, tb=16384):
    """Forward pass of Net. x: (B, 10) f32. Returns (B, 2) f32."""
    B = x.shape[0]

    # Biases as column vectors so they broadcast along the lane (batch) axis.
    b1c = b1.reshape(D_HID, 1)           # (20, 1)
    b2c = b2.reshape(D_OUT, 1)           # (2, 1)

    # Tile selection:
    #  - lane dim of the output block must be a multiple of 128 (or == B), so
    #    force tb to a multiple of 128 on the multi-tile path.
    #  - for B > 256 guarantee >= 2 grid steps (v7x megacore sharding).
    tb = max(128, (tb // 128) * 128)
    if B <= 256:
        TB = B                           # single tile; block dims == full dims
    else:
        half = ((-(-B // 2)) + 127) // 128 * 128   # round_up_128(ceil(B/2))
        TB = min(tb, half)
    grid = (pl.cdiv(B, TB),)             # ragged last block handled by Pallas

    out_t = pl.pallas_call(
        _mlp_kernel,
        out_shape=jax.ShapeDtypeStruct((D_OUT, B), jnp.float32),
        grid=grid,
        in_specs=[
            pl.BlockSpec((TB, D_IN), lambda i: (i, 0)),        # streamed x tiles
            pl.BlockSpec((D_HID, D_IN), lambda i: (0, 0)),     # W1, VMEM-resident
            pl.BlockSpec((D_HID, 1), lambda i: (0, 0)),        # b1, VMEM-resident
            pl.BlockSpec((D_OUT, D_HID), lambda i: (0, 0)),    # W2, VMEM-resident
            pl.BlockSpec((D_OUT, 1), lambda i: (0, 0)),        # b2, VMEM-resident
        ],
        out_specs=pl.BlockSpec((D_OUT, TB), lambda i: (0, i)),
        compiler_params=pltpu.CompilerParams(
            dimension_semantics=("parallel",),       # batch steps are independent
            vmem_limit_bytes=48 * 1024 * 1024,       # > v5e 16MiB default, < v7x 64MiB
        ),
    )(x, w1, b1c, w2, b2c)

    # Back to the PyTorch contract (B, 2).  Cheap (8 B/elem) relative to the
    # 40 B/elem x stream; drop it if the consumer accepts (2, B).
    return jnp.transpose(out_t)


def _reference(x, w1, b1, w2, b2):
    h = jnp.maximum(jnp.dot(x, w1.T, precision="highest") + b1, 0.0)
    return jnp.dot(h, w2.T, precision="highest") + b2


if __name__ == "__main__":
    key = jax.random.PRNGKey(0)
    k_x, k_w1, k_b1, k_w2, k_b2, k_x2 = jax.random.split(key, 6)

    # Deterministic synthetic parameters (PyTorch Linear shapes: (out, in)).
    B = 8
    x = jax.random.normal(k_x, (B, D_IN), dtype=jnp.float32)
    w1 = jax.random.normal(k_w1, (D_HID, D_IN), dtype=jnp.float32) * 0.1
    b1 = jax.random.normal(k_b1, (D_HID,), dtype=jnp.float32) * 0.1
    w2 = jax.random.normal(k_w2, (D_OUT, D_HID), dtype=jnp.float32) * 0.1
    b2 = jax.random.normal(k_b2, (D_OUT,), dtype=jnp.float32) * 0.1

    # Small-batch path (single tile, block dims == full array dims).
    out = net_forward(x, w1, b1, w2, b2)
    jax.block_until_ready(out)
    ref = _reference(x, w1, b1, w2, b2)
    assert out.shape == (B, D_OUT)
    assert jnp.allclose(out, ref, atol=1e-4, rtol=1e-4)

    # Multi-step path: >=2 grid steps, ragged (masked) last block, no padding.
    B2 = 300
    x2 = jax.random.normal(k_x2, (B2, D_IN), dtype=jnp.float32)
    out2 = net_forward(x2, w1, b1, w2, b2)            # TB=256, grid=(2,)
    jax.block_until_ready(out2)
    ref2 = _reference(x2, w1, b1, w2, b2)
    assert out2.shape == (B2, D_OUT)
    assert jnp.allclose(out2, ref2, atol=1e-4, rtol=1e-4)

    # Explicit small tile to exercise >2 steps with a ragged tail.
    out3 = net_forward(x2, w1, b1, w2, b2, tb=128)    # TB=128, grid=(3,)
    jax.block_until_ready(out3)
    assert jnp.allclose(out3, ref2, atol=1e-4, rtol=1e-4)

    print("KERNEL_OK")
</pallas_src>

<mosaic_0001>
module attributes {stable_mosaic.version = 11 : i64} {
  func.func @_mlp_kernel(%arg0: i32, %arg1: memref<8x10xf32, #tpu.memory_space<vmem>>, %arg2: memref<20x10xf32, #tpu.memory_space<vmem>>, %arg3: memref<20x1xf32, #tpu.memory_space<vmem>>, %arg4: memref<2x20xf32, #tpu.memory_space<vmem>>, %arg5: memref<2x1xf32, #tpu.memory_space<vmem>>, %arg6: memref<2x8xf32, #tpu.memory_space<vmem>>) attributes {dimension_semantics = [#tpu.dimension_semantics<parallel>], iteration_bounds = array<i64: 1>, scalar_prefetch = 0 : i64, scratch_operands = 0 : i64, tpu.core_type = #tpu.core_type<tc>, window_params = [{transform_indices = @transform_0, window_bounds = array<i64: 8, 10>}, {pipeline_mode = #tpu.pipeline_mode<synchronous>, transform_indices = @transform_1, window_bounds = array<i64: 20, 10>}, {pipeline_mode = #tpu.pipeline_mode<synchronous>, transform_indices = @transform_2, window_bounds = array<i64: 20, 1>}, {pipeline_mode = #tpu.pipeline_mode<synchronous>, transform_indices = @transform_3, window_bounds = array<i64: 2, 20>}, {pipeline_mode = #tpu.pipeline_mode<synchronous>, transform_indices = @transform_4, window_bounds = array<i64: 2, 1>}, {transform_indices = @transform_5, window_bounds = array<i64: 2, 8>}]} {
    %c0 = arith.constant 0 : index
    %c0_0 = arith.constant 0 : index
    %0 = vector.load %arg1[%c0, %c0_0] : memref<8x10xf32, #tpu.memory_space<vmem>>, vector<8x10xf32>
    %c0_1 = arith.constant 0 : index
    %c0_2 = arith.constant 0 : index
    %1 = vector.load %arg2[%c0_1, %c0_2] : memref<20x10xf32, #tpu.memory_space<vmem>>, vector<20x10xf32>
    %c0_3 = arith.constant 0 : index
    %c0_4 = arith.constant 0 : index
    %2 = vector.load %arg3[%c0_3, %c0_4] : memref<20x1xf32, #tpu.memory_space<vmem>>, vector<20x1xf32>
    %c0_5 = arith.constant 0 : index
    %c0_6 = arith.constant 0 : index
    %3 = vector.load %arg4[%c0_5, %c0_6] : memref<2x20xf32, #tpu.memory_space<vmem>>, vector<2x20xf32>
    %c0_7 = arith.constant 0 : index
    %c0_8 = arith.constant 0 : index
    %4 = vector.load %arg5[%c0_7, %c0_8] : memref<2x1xf32, #tpu.memory_space<vmem>>, vector<2x1xf32>
    %cst = arith.constant dense<0.000000e+00> : vector<20x8xf32>
    %5 = tpu.matmul %1, %0, %cst {dimension_numbers = #tpu.dot_dimension_numbers<[1], [1], [0], [0], [0, 0, 1, 0], [], []>} : vector<20x10xf32>, vector<8x10xf32>, vector<20x8xf32> -> vector<20x8xf32>
    %6 = vector.broadcast %2 : vector<20x1xf32> to vector<20x8xf32>
    %7 = arith.addf %5, %6 : vector<20x8xf32>
    %cst_9 = arith.constant 0.000000e+00 : f32
    %8 = vector.broadcast %cst_9 : f32 to vector<20x8xf32>
    %9 = arith.maximumf %7, %8 : vector<20x8xf32>
    %cst_10 = arith.constant dense<0.000000e+00> : vector<2x8xf32>
    %10 = tpu.matmul %3, %9, %cst_10 {dimension_numbers = #tpu.dot_dimension_numbers<[1], [0], [0], [1], [0, 0, 1, 1], [], []>} : vector<2x20xf32>, vector<20x8xf32>, vector<2x8xf32> -> vector<2x8xf32>
    %11 = vector.broadcast %4 : vector<2x1xf32> to vector<2x8xf32>
    %12 = arith.addf %10, %11 : vector<2x8xf32>
    %c0_11 = arith.constant 0 : index
    %c0_12 = arith.constant 0 : index
    %13 = vector.load %arg6[%c0_11, %c0_12] : memref<2x8xf32, #tpu.memory_space<vmem>>, vector<2x8xf32>
    tpu.vector_store %arg6[%c0_11, %c0_12], %12 {strides = array<i32>} : memref<2x8xf32, #tpu.memory_space<vmem>>, vector<2x8xf32>,
    return
  }
  func.func @transform_0(%arg0: i32) -> (i32, i32) {
    %c0_i32 = arith.constant 0 : i32
    %c0_i32_0 = arith.constant 0 : i32
    return %arg0, %c0_i32 : i32, i32
  }
  func.func @transform_1(%arg0: i32) -> (i32, i32) {
    %c0_i32 = arith.constant 0 : i32
    %c0_i32_0 = arith.constant 0 : i32
    %c0_i32_1 = arith.constant 0 : i32
    return %c0_i32, %c0_i32_0 : i32, i32
  }
  func.func @transform_2(%arg0: i32) -> (i32, i32) {
    %c0_i32 = arith.constant 0 : i32
    %c0_i32_0 = arith.constant 0 : i32
    %c0_i32_1 = arith.constant 0 : i32
    return %c0_i32, %c0_i32_0 : i32, i32
  }
  func.func @transform_3(%arg0: i32) -> (i32, i32) {
    %c0_i32 = arith.constant 0 : i32
    %c0_i32_0 = arith.constant 0 : i32
    %c0_i32_1 = arith.constant 0 : i32
    return %c0_i32, %c0_i32_0 : i32, i32
  }
  func.func @transform_4(%arg0: i32) -> (i32, i32) {
    %c0_i32 = arith.constant 0 : i32
    %c0_i32_0 = arith.constant 0 : i32
    %c0_i32_1 = arith.constant 0 : i32
    return %c0_i32, %c0_i32_0 : i32, i32
  }
  func.func @transform_5(%arg0: i32) -> (i32, i32) {
    %c0_i32 = arith.constant 0 : i32
    %c0_i32_0 = arith.constant 0 : i32
    return %c0_i32, %arg0 : i32, i32
  }
}

</mosaic_0001>

<bundles_post_ra>
// kernel: net_forward.1
= control target key start
LH: loop header
LB: loop body
LE: loop exit
PB: predicated region body
PF: predicated region fallthrough
CT: control target
= control target key end

     0   :  { %vm45_vm0 = vcmask 80896   ;;  %v308_v1 = vmov 0.0   ;;  %vm309_vm1 = vmmov 0   ;;  %v310_v4 = vmov 0   ;;  %s390_s0 = inlined_call_operand.vmem [shape: f32[8,10], index: 0, kind: input, shape index: {}]   ;;  %s391_s1 = inlined_call_operand.vmem [shape: f32[20,10], index: 1, kind: input, shape index: {}]   ;;  %s392_s2 = inlined_call_operand.vmem [shape: f32[20,1], index: 2, kind: input, shape index: {}]   ;;  %s393_s3 = inlined_call_operand.vmem [shape: f32[2,20], index: 3, kind: input, shape index: {}]   ;;  %s394_s4 = inlined_call_operand.vmem [shape: f32[2,1], index: 4, kind: input, shape index: {}]   ;;  %s395_s5 = inlined_call_operand.hbm [shape: f32[2,8], index: 5, kind: output, shape index: {}]  }
   0x1   :  { %v21_v0 = vld [vmem:[%s390_s0] sm:$0xff]  ;;  %254 = vmatprep.subr.mxu0 %v308_v1  ;;  %256 = vmatprep.mubr.msk.f32.mxu0 %vm309_vm1, %v308_v1  ;;  %v27_v5 = vld [vmem:[%s392_s2 + $0x10] sm:$0xf] }
   0x2   :  { %v25_v2 = vld [vmem:[%s392_s2] sm:$0xff]  ;;  %255 = vmatpush3.xpose.msk.msra.mxu0 %vm45_vm0, %v21_v0  ;;  %282 = vset.pattern.permute.xlu0 %v310_v4 }
   0x3   :  { %v22_v3 = vld [vmem:[%s391_s1] sm:$0xff] }
   0x4   :  { %10 = vsyncpa [#allocation3], 0  ;;  %32 = vperm.xlu0 %282, %v25_v2   ;;  %283 = vset.pattern.permute.xlu1 %v310_v4  ;;  %v26_v6 = vld [vmem:[%s392_s2 + $0x8] sm:$0xff]  ;;  %v29_v7 = vld [vmem:[%s394_s4] sm:$0x3]  ;;  %v311_v10 = vmov 0.0|0.0  }
   0x5   :  { %42 = vperm.xlu1 %283, %v27_v5   ;;  %271 = vmatprep.mubr.msk.f32.mxu1 %vm309_vm1, %v308_v1  ;;  %v23_v8 = vld [vmem:[%s391_s1 + $0x8] sm:$0xff]  ;;  %v24_v9 = vld [vmem:[%s391_s1 + $0x10] sm:$0xf]  ;;  %vm150_vm2 = vcmask 1043456   ;;  %v28_v27 = vld [vmem:[%s393_s3] sm:$0x3] }
   0x6   :  { %257 = vmatmul.mubr.msk.f32.vlgmr.msra.gmra.mrb[0].mxu0 %vm45_vm0, %v22_v3  ;;  %274 = vmatprep.subr.bf16.mxu1 %v311_v10  ;;  %vm146_vm3 = vcmask 162816   ;;  %s312_s7 = smov [#allocation2]   ;;  %vm224_vm4 = vcmask 58368  }
   0x7   :  { %259 = vmatprep.mubr.msk.f32.mxu0 %vm309_vm1, %v308_v1  ;;  %s232_s8 = sshll.u32 %s312_s7, 4  ;;  %s233_s8 = int_to_ptr.vmem [resolvable:$true] %s232_s8 }
   0x8   :  { %37 = vperm.xlu0 %282, %v26_v6   ;;  %s284_s9 = scalar_lea.vmem %s233_s8, 32  ;;  %p289_p1 = scmp.lt.s32.totalorder %s233_s8, %s233_s8 }
   0x9   :  { %143 = vperm.xlu1 %283, %v29_v7   ;;  %p285_p0 = scmp.ne.s32.totalorder %s233_s8, %s284_s9  ;;  %p290_p2 = scmp.lt.s32.totalorder %s284_s9, %s284_s9 }
   0xa   :  { %260 = vmatmul.mubr.msk.f32.gmra.mrb[2].mxu0 %vm45_vm0, %v23_v8 }
   0xb   :  { %262 = vmatprep.mubr.msk.f32.mxu0 %vm309_vm1, %v308_v1  ;;  %p291_p3 = por %p290_p2, %p289_p1 }
   0xd   :  { %p292_p4 = pnand %p291_p3, %p285_p0 }
   0xe   :  { %263 = vmatmul.mubr.msk.f32.gmra.mrb[4].mxu0 %vm45_vm0, %v24_v9 }
  0x83   :  { %v33_v11 = vpop.permute.xlu0 %32 }
  0x84   :  { %v43_v21 = vpop.permute.xlu1 %42 }
  0x87   :  { %v38_v15 = vpop.permute.xlu0 %37 }
  0x88   :  { %v144_v28 = vpop.permute.xlu1 %143 }
  0xd9   :  { %v124_v12 = vpop.f32.mrb[0].mxu0 }
  0xda   :  { %v258_v13 = vpop.f32.mrb[1].mxu0  ;;  %v125_v14 = vadd.f32 %v124_v12, %v33_v11 }
  0xdc   :  { %v138_v19 = vmax.f32 %v125_v14, 0.0 }
  0xdd   :  { %v129_v16 = vpop.f32.mrb[2].mxu0 }
  0xde   :  { %v130_v17 = vadd.f32 %v129_v16, %v38_v15  ;;  %v261_v18 = vpop.f32.mrb[3].mxu0 }
  0xe0   :  { %v139_v20 = vmax.f32 %v130_v17, 0.0 }
  0xe1   :  { %v134_v22 = vpop.f32.mrb[4].mxu0 }
  0xe2   :  { %v135_v23 = vadd.f32 %v134_v22, %v43_v21  ;;  %v264_v24 = vpop.f32.mrb[5].mxu0  ;;  %v275_v25 = vpack.c.bf16 %v139_v20, %v138_v19 }
  0xe4   :  { %v140_v26 = vmax.f32 %v135_v23, 0.0  ;;  %276 = vmatpush3.bf16.msra.mxu1 %v275_v25 }
  0xe5   :  { %269 = vmatprep.subr.mxu1 %v308_v1 }
  0xe8   :  { %270 = vmatpush3.msk.msra.mxu1 %vm150_vm2, %v140_v26 }
  0xe9   :  { %272 = vmatmul.mubr.msk.f32.vlgmr.msra.gmra.mrb[0].mxu1 %vm146_vm3, %v28_v27 }
 0x1bc   :  { %v220_v29 = vpop.f32.mrb[0].mxu1 }
 0x1bd   :  { %v221_v30 = vadd.f32 %v220_v29, %v144_v28  ;;  %v273_v31 = vpop.f32.mrb[1].mxu1 }
 0x1bf   :  { %225 = vst.msk [vmem:[#allocation2] sm:$0x3] %vm224_vm4, %v221_v30 }
 0x1c0   :  { %295 = shalt.err (!%p292_p4)
}
 0x1c1   :  { %s296_s11 = scalar_lea.hbm %s395_s5, 32 }
 0x1c2   :  { %p297_p5 = scmp.ne.s32.totalorder %s395_s5, %s296_s11  ;;  %p300_p6 = scmp.lt.u32.totalorder %s296_s11, %s395_s5 }
 0x1c4   :  { %p302_p7 = pnand %p300_p6, %p297_p5 }
 0x1c6   :  { %305 = shalt.err (!%p302_p7)
}
 0x1c7   :  { %235 = dma.vmem_to_hbm [thread:$0]  %s233_s8, 32, %s395_s5, [#allocation3]  }
 0x1c8   :  { %306 = dma.done.wait [#allocation3], 32  }
 0x1c9   :  { %307 = vsyncadd [#allocation3], 4294967264 }
 0x1ca   :  { %239 = vsyncpa [#allocation3], 1 }

</bundles_post_ra>
